<compile_context>
chip_gen: v7x
topology: tpu7x:2x2x1
jax: 0.10.0
libtpu: 0.0.40
codegen_flags: <defaults>
</compile_context>

<pallas_src>
import functools

import jax
import jax.numpy as jnp
from jax.experimental import pallas as pl
from jax.experimental.pallas import tpu as pltpu

_LANE = 128
_SUBLANE = 8


def _round_up(x, m):
    return ((x + m - 1) // m) * m


def _vmem_capacity_bytes():
    """Per-core physical VMEM; conservative fallback if the query is unavailable."""
    try:
        cap = getattr(pltpu.get_tpu_info(), "vmem_capacity_bytes", None)
        if cap:
            return int(cap)
    except Exception:
        pass
    return 64 * 1024 * 1024  # v7x has the smallest VMEM (64 MiB); safe for v5e/v6e too


def mlp_kernel(x_ref, w_in_ref, b_in_ref, w_h_ref, b_h_ref, w_out_ref, b_out_ref,
               o_ref, *, n_hidden):
    """One batch tile of the MLP forward (batch-on-sublanes, transpose-free).

    Shapes seen by the kernel:
      x_ref     : (TB, 5)
      w_in_ref  : (5, H)     b_in_ref : (1, H)
      w_h_ref   : (L', H, H) b_h_ref  : (L', 1, H)   (per-layer, (in, out) orientation)
      w_out_ref : (1, H)     b_out_ref: (1, 1) scalar in SMEM
      o_ref     : (TB, 1)
    """
    x = x_ref[...]                       # (TB, 5)
    n_feat = x_ref.shape[1]

    # Input layer Linear(5 -> H) on the VPU: with only 5 input features an MXU pass
    # would be >95% padding, and rank-1 updates avoid any K=5 masking concerns.
    h = x[:, 0:1] * w_in_ref[0:1, :] + b_in_ref[...]
    for f in range(1, n_feat):
        h = h + x[:, f:f + 1] * w_in_ref[f:f + 1, :]
    h = jnp.maximum(h, 0.0)
    # TODO(synk): nn.Dropout is identity in eval mode; no stochastic masking here.

    # Hidden layers Linear(H, H) + ReLU on the MXU, statically unrolled.
    # TODO(synk): for H >= 256, cast h / w_h to bf16 here (keep f32 accumulation) to
    # use the bf16-native MXU; at small H the kernel is DMA/overhead-bound.
    for i in range(n_hidden):
        h = jnp.dot(h, w_h_ref[i], preferred_element_type=jnp.float32)
        h = jnp.maximum(h + b_h_ref[i], 0.0)

    # Output layer Linear(H -> 1): elementwise mul + lane reduction (XLU),
    # avoiding an N=1 MXU matmul.  b_out comes from SMEM as a scalar.
    out = jnp.sum(h * w_out_ref[...], axis=1, keepdims=True) + b_out_ref[0, 0]
    o_ref[...] = out.astype(o_ref.dtype)


def prepare_params(params):
    """One-time layout plumbing (call once, reuse across forwards)."""
    w_in, b_in, w_h, b_h, w_out, b_out = params
    H = w_in.shape[1]
    L = int(w_h.shape[0])
    if L == 0:
        # Dummy (never read, n_hidden=0) so pallas_call has no zero-sized operand.
        w_h = jnp.zeros((1, H, H), jnp.float32)
        b_h = jnp.zeros((1, 1, H), jnp.float32)
    return (
        w_in.astype(jnp.float32),                    # (5, H)
        b_in.reshape(1, H).astype(jnp.float32),      # (1, H)
        w_h.astype(jnp.float32),                     # (max(L,1), H, H)
        b_h.reshape(-1, 1, H).astype(jnp.float32),   # (max(L,1), 1, H)
        w_out.reshape(1, H).astype(jnp.float32),     # (1, H)  (== w_out.T for a vector)
        b_out.reshape(1, 1).astype(jnp.float32),     # (1, 1)  -> SMEM scalar
        L,                                           # static hidden-layer count
    )


def mlp_forward(x, prepared, *, block_b=4096):
    """Forward pass. x: (B, 5) float32 -> (B, 1) float32 (matches Model.eval())."""
    w_in, b_in, w_h, b_h, w_out, b_out, L = prepared
    B, F = x.shape
    H = w_in.shape[1]
    L_eff = w_h.shape[0]

    # ---- batch-tile selection --------------------------------------------------
    # Big tiles amortize the ~0.35 us / grid-step overhead and keep DMAs large,
    # capped by a generation-aware VMEM budget (v7x 64 MiB vs v5e/v6e 128 MiB).
    weight_elems = w_in.size + b_in.size + w_h.size + b_h.size + w_out.size
    weight_bytes = 2 * 4 * weight_elems        # Pallas double-buffers even constant blocks
    vmem_budget = int(0.7 * _vmem_capacity_bytes())

    def tile_bytes(t):
        # (t, 5) / (t, 1) VMEM blocks lane-pad to 128 and are double-buffered, plus
        # ~3 live (t, H) activation copies (vreg spill also lives in VMEM).
        io_buf = (2 + 2) * t * _LANE * 4
        act = 3 * t * _round_up(max(H, 1), _LANE) * 4
        return io_buf + act

    tb = max(_SUBLANE, min(_round_up(block_b, _SUBLANE), _round_up(B, _SUBLANE)))
    while tb > _SUBLANE and weight_bytes + tile_bytes(tb) > vmem_budget:
        tb = max(_SUBLANE, _round_up(tb // 2, _SUBLANE))

    # v7x megacore: keep >= 2 batch tiles so dimension_semantics=("parallel",) can
    # shard them across both TensorCores (one cheap extra grid step on v5e/v6e).
    if pl.cdiv(B, tb) < 2 and B >= 2 * _LANE:
        tb = _round_up(pl.cdiv(B, 2), _SUBLANE)

    grid_b = pl.cdiv(B, tb)
    B_pad = grid_b * tb
    x_p = x if B_pad == B else jnp.pad(x, ((0, B_pad - B), (0, 0)))

    vmem_limit = int(min(vmem_budget,
                         max(8 * 1024 * 1024, 2 * (weight_bytes + tile_bytes(tb)))))

    cost = pl.CostEstimate(
        flops=2 * B_pad * (F * H + L * H * H + H),
        bytes_accessed=4 * (B_pad * F + B_pad + weight_elems),
        transcendentals=0,
    )

    out = pl.pallas_call(
        functools.partial(mlp_kernel, n_hidden=L),
        out_shape=jax.ShapeDtypeStruct((B_pad, 1), jnp.float32),
        grid=(grid_b,),
        in_specs=[
            pl.BlockSpec((tb, F), lambda i: (i, 0)),             # x: blocked over batch
            # Weights/biases: constant index_map -> DMA'd once, VMEM-resident.
            # TODO(synk): pipeline_mode=pl.Buffered(1) would halve their residency for
            # very large H*L stacks on v7x; left at the default for compile safety.
            pl.BlockSpec((F, H), lambda i: (0, 0)),
            pl.BlockSpec((1, H), lambda i: (0, 0)),
            pl.BlockSpec((L_eff, H, H), lambda i: (0, 0, 0)),
            pl.BlockSpec((L_eff, 1, H), lambda i: (0, 0, 0)),
            pl.BlockSpec((1, H), lambda i: (0, 0)),
            pl.BlockSpec(memory_space=pltpu.MemorySpace.SMEM),   # b_out scalar
        ],
        out_specs=pl.BlockSpec((tb, 1), lambda i: (i, 0)),
        compiler_params=pltpu.CompilerParams(
            dimension_semantics=("parallel",),   # megacore sharding on v7x
            vmem_limit_bytes=vmem_limit,
        ),
        cost_estimate=cost,
    )(x_p, w_in, b_in, w_h, b_h, w_out, b_out)

    # Drop batch padding, return PyTorch-shaped (B, 1).
    return out[:B]


def init_params(key, h_layers, layer_neurones, in_dim=5, out_dim=1):
    """Deterministic synthetic weights (PyTorch-Linear-like uniform fan-in scaling)."""
    ks = jax.random.split(key, 6)

    def uni(k, shape, fan_in):
        bound = 1.0 / jnp.sqrt(jnp.float32(fan_in))
        return jax.random.uniform(k, shape, jnp.float32, -bound, bound)

    w_in = uni(ks[0], (in_dim, layer_neurones), in_dim)
    b_in = uni(ks[1], (1, layer_neurones), in_dim)
    w_h = uni(ks[2], (h_layers, layer_neurones, layer_neurones), layer_neurones)
    b_h = uni(ks[3], (h_layers, 1, layer_neurones), layer_neurones)
    w_out = uni(ks[4], (layer_neurones, out_dim), layer_neurones)
    b_out = uni(ks[5], (1, out_dim), layer_neurones)
    return w_in, b_in, w_h, b_h, w_out, b_out


def mlp_reference(x, params):
    """Pure-JAX reference for correctness checking."""
    w_in, b_in, w_h, b_h, w_out, b_out = params
    hp = jax.lax.Precision.HIGHEST
    h = jnp.maximum(jnp.dot(x, w_in, precision=hp) + b_in, 0.0)
    for i in range(w_h.shape[0]):
        h = jnp.maximum(jnp.dot(h, w_h[i], precision=hp) + b_h[i], 0.0)
    return jnp.dot(h, w_out, precision=hp) + b_out


if __name__ == "__main__":
    key = jax.random.PRNGKey(0)
    k_params, k_x = jax.random.split(key)

    h_layers = 2          # hLayers
    layer_neurones = 32   # layerNeurones
    batch = 8

    params = init_params(k_params, h_layers, layer_neurones)
    prepared = prepare_params(params)        # one-time weight plumbing (cached/reused)
    x = jax.random.normal(k_x, (batch, 5), jnp.float32)

    out = mlp_forward(x, prepared)
    out = jax.block_until_ready(out)

    ref = mlp_reference(x, params)
    assert out.shape == (batch, 1), out.shape
    assert jnp.allclose(out, ref, atol=1e-4, rtol=1e-4), (out, ref)

    print("KERNEL_OK")
</pallas_src>

<mosaic_0001>
module attributes {stable_mosaic.version = 11 : i64} {
  func.func @mlp_kernel(%arg0: i32, %arg1: memref<8x5xf32, #tpu.memory_space<vmem>>, %arg2: memref<5x32xf32, #tpu.memory_space<vmem>>, %arg3: memref<1x32xf32, #tpu.memory_space<vmem>>, %arg4: memref<2x32x32xf32, #tpu.memory_space<vmem>>, %arg5: memref<2x1x32xf32, #tpu.memory_space<vmem>>, %arg6: memref<1x32xf32, #tpu.memory_space<vmem>>, %arg7: memref<1x1xf32, #tpu.memory_space<smem>>, %arg8: memref<8x1xf32, #tpu.memory_space<vmem>>) attributes {dimension_semantics = [#tpu.dimension_semantics<parallel>], iteration_bounds = array<i64: 1>, scalar_prefetch = 0 : i64, scratch_operands = 0 : i64, tpu.core_type = #tpu.core_type<tc>, window_params = [{transform_indices = @transform_0, window_bounds = array<i64: 8, 5>}, {pipeline_mode = #tpu.pipeline_mode<synchronous>, transform_indices = @transform_1, window_bounds = array<i64: 5, 32>}, {pipeline_mode = #tpu.pipeline_mode<synchronous>, transform_indices = @transform_2, window_bounds = array<i64: 1, 32>}, {pipeline_mode = #tpu.pipeline_mode<synchronous>, transform_indices = @transform_3, window_bounds = array<i64: 2, 32, 32>}, {pipeline_mode = #tpu.pipeline_mode<synchronous>, transform_indices = @transform_4, window_bounds = array<i64: 2, 1, 32>}, {pipeline_mode = #tpu.pipeline_mode<synchronous>, transform_indices = @transform_5, window_bounds = array<i64: 1, 32>}, {transform_indices = @transform_6, window_bounds = array<i64: 1, 1>}, {transform_indices = @transform_7, window_bounds = array<i64: 8, 1>}]} {
    %c0 = arith.constant 0 : index
    %c0_0 = arith.constant 0 : index
    %0 = vector.load %arg1[%c0, %c0_0] : memref<8x5xf32, #tpu.memory_space<vmem>>, vector<8x5xf32>
    %1 = vector.extract_strided_slice %0 {offsets = [0, 0], sizes = [8, 1], strides = [1, 1]} : vector<8x5xf32> to vector<8x1xf32>
    %c0_1 = arith.constant 0 : index
    %c0_2 = arith.constant 0 : index
    %2 = vector.load %arg2[%c0_1, %c0_2] : memref<5x32xf32, #tpu.memory_space<vmem>>, vector<1x32xf32>
    %3 = vector.broadcast %1 : vector<8x1xf32> to vector<8x32xf32>
    %4 = vector.broadcast %2 : vector<1x32xf32> to vector<8x32xf32>
    %5 = arith.mulf %3, %4 : vector<8x32xf32>
    %c0_3 = arith.constant 0 : index
    %c0_4 = arith.constant 0 : index
    %6 = vector.load %arg3[%c0_3, %c0_4] : memref<1x32xf32, #tpu.memory_space<vmem>>, vector<1x32xf32>
    %7 = vector.broadcast %6 : vector<1x32xf32> to vector<8x32xf32>
    %8 = arith.addf %5, %7 : vector<8x32xf32>
    %9 = vector.extract_strided_slice %0 {offsets = [0, 1], sizes = [8, 1], strides = [1, 1]} : vector<8x5xf32> to vector<8x1xf32>
    %c1 = arith.constant 1 : index
    %c0_5 = arith.constant 0 : index
    %10 = vector.load %arg2[%c1, %c0_5] : memref<5x32xf32, #tpu.memory_space<vmem>>, vector<1x32xf32>
    %11 = vector.broadcast %9 : vector<8x1xf32> to vector<8x32xf32>
    %12 = vector.broadcast %10 : vector<1x32xf32> to vector<8x32xf32>
    %13 = arith.mulf %11, %12 : vector<8x32xf32>
    %14 = arith.addf %8, %13 : vector<8x32xf32>
    %15 = vector.extract_strided_slice %0 {offsets = [0, 2], sizes = [8, 1], strides = [1, 1]} : vector<8x5xf32> to vector<8x1xf32>
    %c2 = arith.constant 2 : index
    %c0_6 = arith.constant 0 : index
    %16 = vector.load %arg2[%c2, %c0_6] : memref<5x32xf32, #tpu.memory_space<vmem>>, vector<1x32xf32>
    %17 = vector.broadcast %15 : vector<8x1xf32> to vector<8x32xf32>
    %18 = vector.broadcast %16 : vector<1x32xf32> to vector<8x32xf32>
    %19 = arith.mulf %17, %18 : vector<8x32xf32>
    %20 = arith.addf %14, %19 : vector<8x32xf32>
    %21 = vector.extract_strided_slice %0 {offsets = [0, 3], sizes = [8, 1], strides = [1, 1]} : vector<8x5xf32> to vector<8x1xf32>
    %c3 = arith.constant 3 : index
    %c0_7 = arith.constant 0 : index
    %22 = vector.load %arg2[%c3, %c0_7] : memref<5x32xf32, #tpu.memory_space<vmem>>, vector<1x32xf32>
    %23 = vector.broadcast %21 : vector<8x1xf32> to vector<8x32xf32>
    %24 = vector.broadcast %22 : vector<1x32xf32> to vector<8x32xf32>
    %25 = arith.mulf %23, %24 : vector<8x32xf32>
    %26 = arith.addf %20, %25 : vector<8x32xf32>
    %27 = vector.extract_strided_slice %0 {offsets = [0, 4], sizes = [8, 1], strides = [1, 1]} : vector<8x5xf32> to vector<8x1xf32>
    %c4 = arith.constant 4 : index
    %c0_8 = arith.constant 0 : index
    %28 = vector.load %arg2[%c4, %c0_8] : memref<5x32xf32, #tpu.memory_space<vmem>>, vector<1x32xf32>
    %29 = vector.broadcast %27 : vector<8x1xf32> to vector<8x32xf32>
    %30 = vector.broadcast %28 : vector<1x32xf32> to vector<8x32xf32>
    %31 = arith.mulf %29, %30 : vector<8x32xf32>
    %32 = arith.addf %26, %31 : vector<8x32xf32>
    %cst = arith.constant 0.000000e+00 : f32
    %33 = vector.broadcast %cst : f32 to vector<8x32xf32>
    %34 = arith.maximumf %32, %33 : vector<8x32xf32>
    %c0_9 = arith.constant 0 : index
    %c0_10 = arith.constant 0 : index
    %c0_11 = arith.constant 0 : index
    %35 = vector.load %arg4[%c0_9, %c0_10, %c0_11] : memref<2x32x32xf32, #tpu.memory_space<vmem>>, vector<1x32x32xf32>
    %36 = vector.shape_cast %35 : vector<1x32x32xf32> to vector<32x32xf32>
    %cst_12 = arith.constant dense<0.000000e+00> : vector<8x32xf32>
    %37 = tpu.matmul %34, %36, %cst_12 {dimension_numbers = #tpu.dot_dimension_numbers<[1], [0], [0], [1], [0, 0, 1, 1], [], []>} : vector<8x32xf32>, vector<32x32xf32>, vector<8x32xf32> -> vector<8x32xf32>
    %c0_13 = arith.constant 0 : index
    %c0_14 = arith.constant 0 : index
    %c0_15 = arith.constant 0 : index
    %38 = vector.load %arg5[%c0_13, %c0_14, %c0_15] : memref<2x1x32xf32, #tpu.memory_space<vmem>>, vector<1x1x32xf32>
    %39 = vector.shape_cast %38 : vector<1x1x32xf32> to vector<1x32xf32>
    %40 = vector.broadcast %39 : vector<1x32xf32> to vector<8x32xf32>
    %41 = arith.addf %37, %40 : vector<8x32xf32>
    %cst_16 = arith.constant 0.000000e+00 : f32
    %42 = vector.broadcast %cst_16 : f32 to vector<8x32xf32>
    %43 = arith.maximumf %41, %42 : vector<8x32xf32>
    %c1_17 = arith.constant 1 : index
    %c0_18 = arith.constant 0 : index
    %c0_19 = arith.constant 0 : index
    %44 = vector.load %arg4[%c1_17, %c0_18, %c0_19] : memref<2x32x32xf32, #tpu.memory_space<vmem>>, vector<1x32x32xf32>
    %45 = vector.shape_cast %44 : vector<1x32x32xf32> to vector<32x32xf32>
    %cst_20 = arith.constant dense<0.000000e+00> : vector<8x32xf32>
    %46 = tpu.matmul %43, %45, %cst_20 {dimension_numbers = #tpu.dot_dimension_numbers<[1], [0], [0], [1], [0, 0, 1, 1], [], []>} : vector<8x32xf32>, vector<32x32xf32>, vector<8x32xf32> -> vector<8x32xf32>
    %c1_21 = arith.constant 1 : index
    %c0_22 = arith.constant 0 : index
    %c0_23 = arith.constant 0 : index
    %47 = vector.load %arg5[%c1_21, %c0_22, %c0_23] : memref<2x1x32xf32, #tpu.memory_space<vmem>>, vector<1x1x32xf32>
    %48 = vector.shape_cast %47 : vector<1x1x32xf32> to vector<1x32xf32>
    %49 = vector.broadcast %48 : vector<1x32xf32> to vector<8x32xf32>
    %50 = arith.addf %46, %49 : vector<8x32xf32>
    %cst_24 = arith.constant 0.000000e+00 : f32
    %51 = vector.broadcast %cst_24 : f32 to vector<8x32xf32>
    %52 = arith.maximumf %50, %51 : vector<8x32xf32>
    %c0_25 = arith.constant 0 : index
    %c0_26 = arith.constant 0 : index
    %53 = vector.load %arg6[%c0_25, %c0_26] : memref<1x32xf32, #tpu.memory_space<vmem>>, vector<1x32xf32>
    %54 = vector.broadcast %53 : vector<1x32xf32> to vector<8x32xf32>
    %55 = arith.mulf %52, %54 : vector<8x32xf32>
    %cst_27 = arith.constant dense<0.000000e+00> : vector<8xf32>
    %56 = vector.multi_reduction <add>, %55, %cst_27 [1] : vector<8x32xf32> to vector<8xf32>
    %57 = vector.shape_cast %56 : vector<8xf32> to vector<8x1xf32>
    %c0_28 = arith.constant 0 : index
    %c0_29 = arith.constant 0 : index
    %58 = memref.load %arg7[%c0_28, %c0_29] : memref<1x1xf32, #tpu.memory_space<smem>>
    %59 = vector.broadcast %58 : f32 to vector<8x1xf32>
    %60 = arith.addf %57, %59 : vector<8x1xf32>
    %c0_30 = arith.constant 0 : index
    %c0_31 = arith.constant 0 : index
    %61 = vector.load %arg8[%c0_30, %c0_31] : memref<8x1xf32, #tpu.memory_space<vmem>>, vector<8x1xf32>
    tpu.vector_store %arg8[%c0_30, %c0_31], %60 {strides = array<i32>} : memref<8x1xf32, #tpu.memory_space<vmem>>, vector<8x1xf32>,
    return
  }
  func.func @transform_0(%arg0: i32) -> (i32, i32) {
    %c0_i32 = arith.constant 0 : i32
    %c0_i32_0 = arith.constant 0 : i32
    return %arg0, %c0_i32 : i32, i32
  }
  func.func @transform_1(%arg0: i32) -> (i32, i32) {
    %c0_i32 = arith.constant 0 : i32
    %c0_i32_0 = arith.constant 0 : i32
    %c0_i32_1 = arith.constant 0 : i32
    return %c0_i32, %c0_i32_0 : i32, i32
  }
  func.func @transform_2(%arg0: i32) -> (i32, i32) {
    %c0_i32 = arith.constant 0 : i32
    %c0_i32_0 = arith.constant 0 : i32
    %c0_i32_1 = arith.constant 0 : i32
    return %c0_i32, %c0_i32_0 : i32, i32
  }
  func.func @transform_3(%arg0: i32) -> (i32, i32, i32) {
    %c0_i32 = arith.constant 0 : i32
    %c0_i32_0 = arith.constant 0 : i32
    %c0_i32_1 = arith.constant 0 : i32
    %c0_i32_2 = arith.constant 0 : i32
    return %c0_i32, %c0_i32_0, %c0_i32_1 : i32, i32, i32
  }
  func.func @transform_4(%arg0: i32) -> (i32, i32, i32) {
    %c0_i32 = arith.constant 0 : i32
    %c0_i32_0 = arith.constant 0 : i32
    %c0_i32_1 = arith.constant 0 : i32
    %c0_i32_2 = arith.constant 0 : i32
    return %c0_i32, %c0_i32_0, %c0_i32_1 : i32, i32, i32
  }
  func.func @transform_5(%arg0: i32) -> (i32, i32) {
    %c0_i32 = arith.constant 0 : i32
    %c0_i32_0 = arith.constant 0 : i32
    %c0_i32_1 = arith.constant 0 : i32
    return %c0_i32, %c0_i32_0 : i32, i32
  }
  func.func @transform_6(%arg0: i32) -> (i32, i32) {
    %c0_i32 = arith.constant 0 : i32
    %c0_i32_0 = arith.constant 0 : i32
    %c0_i32_1 = arith.constant 0 : i32
    return %c0_i32, %c0_i32_0 : i32, i32
  }
  func.func @transform_7(%arg0: i32) -> (i32, i32) {
    %c0_i32 = arith.constant 0 : i32
    %c0_i32_0 = arith.constant 0 : i32
    return %arg0, %c0_i32 : i32, i32
  }
}

</mosaic_0001>

<bundles_post_ra>
// kernel: tpu_custom_call.1
= control target key start
LH: loop header
LB: loop body
LE: loop exit
PB: predicated region body
PF: predicated region fallthrough
CT: control target
= control target key end

     0   :  { %13 = vsyncpa [#allocation4], 0  ;;  %s579_s0 = inlined_call_operand.hbm [shape: f32[8,5], index: 0, kind: input, shape index: {}]   ;;  %s580_s1 = inlined_call_operand.hbm [shape: f32[5,32], index: 1, kind: input, shape index: {}]   ;;  %s581_s2 = inlined_call_operand.vmem [shape: f32[1,32], index: 2, kind: input, shape index: {}]   ;;  %s582_s3 = inlined_call_operand.hbm [shape: f32[2,32,32], index: 3, kind: input, shape index: {}]   ;;  %s583_s4 = inlined_call_operand.vmem [shape: f32[2,1,32], index: 4, kind: input, shape index: {}]   ;;  %s584_s5 = inlined_call_operand.vmem [shape: f32[1,32], index: 5, kind: input, shape index: {}]   ;;  %s585_s6 = inlined_call_operand.<no memory space> [shape: f32[1,1], index: 6, kind: input, shape index: {}]   ;;  %s586_s7 = inlined_call_operand.vmem [shape: f32[8,1], index: 7, kind: output, shape index: {}]  }
   0x1   :  { %14 = vsyncpa [#allocation6], 0  ;;  %s469_s24 = smov [#allocation5]   ;;  %s470_s26 = smov [#allocation3]  }
   0x2   :  { %s31_s25 = sshll.u32 %s469_s24, 4  ;;  %s21_s27 = sshll.u32 %s470_s26, 4  ;;  %s32_s25 = int_to_ptr.vmem [resolvable:$true] %s31_s25  ;;  %s22_s27 = int_to_ptr.vmem [resolvable:$true] %s21_s27 }
   0x3   :  { %s399_s30 = scalar_lea.hbm %s580_s1, 128 }
   0x4   :  { %p400_p0 = scmp.ne.s32.totalorder %s580_s1, %s399_s30  ;;  %p403_p1 = scmp.lt.u32.totalorder %s399_s30, %s580_s1 }
   0x6   :  { %p405_p2 = pnand %p403_p1, %p400_p0 }
   0x8   :  { %408 = shalt.err (!%p405_p2)
}
   0x9   :  { %s409_s12 = scalar_lea.vmem %s32_s25, 128  ;;  %p414_p4 = scmp.lt.s32.totalorder %s32_s25, %s32_s25 }
   0xa   :  { %p410_p3 = scmp.ne.s32.totalorder %s32_s25, %s409_s12  ;;  %p415_p5 = scmp.lt.s32.totalorder %s409_s12, %s409_s12 }
   0xc   :  { %p416_p6 = por %p415_p5, %p414_p4 }
   0xe   :  { %p417_p7 = pnand %p416_p6, %p410_p3 }
  0x10   :  { %420 = shalt.err (!%p417_p7)
}
  0x11   :  { %34 = dma.hbm_to_vmem [thread:$0]  %s580_s1, 128, %s32_s25, [#allocation6]  }
  0x12   :  { %s421_s17 = scalar_lea.hbm %s579_s0, 128 }
  0x13   :  { %p422_p8 = scmp.ne.s32.totalorder %s579_s0, %s421_s17  ;;  %p425_p9 = scmp.lt.u32.totalorder %s421_s17, %s579_s0 }
  0x15   :  { %p427_p10 = pnand %p425_p9, %p422_p8 }
  0x17   :  { %430 = shalt.err (!%p427_p10)
}
  0x18   :  { %s431_s22 = scalar_lea.vmem %s22_s27, 128  ;;  %p436_p12 = scmp.lt.s32.totalorder %s22_s27, %s22_s27 }
  0x19   :  { %p432_p11 = scmp.ne.s32.totalorder %s22_s27, %s431_s22  ;;  %p437_p13 = scmp.lt.s32.totalorder %s431_s22, %s431_s22 }
  0x1b   :  { %p438_p0 = por %p437_p13, %p436_p12 }
  0x1d   :  { %p439_p1 = pnand %p438_p0, %p432_p11 }
  0x1f   :  { %442 = shalt.err (!%p439_p1)
}
  0x20   :  { %24 = dma.hbm_to_vmem [thread:$0]  %s579_s0, 128, %s22_s27, [#allocation4]  }
  0x21   :  { %s471_s24 = smov [#allocation7]   ;;  %s443_s29 = scalar_lea.hbm %s582_s3, 1024 }
  0x22   :  { %s42_s25 = sshll.u32 %s471_s24, 4  ;;  %p444_p2 = scmp.ne.s32.totalorder %s582_s3, %s443_s29  ;;  %s43_s25 = int_to_ptr.vmem [resolvable:$true] %s42_s25 }
  0x23   :  { %p447_p3 = scmp.lt.u32.totalorder %s443_s29, %s582_s3 }
  0x25   :  { %p449_p4 = pnand %p447_p3, %p444_p2 }
  0x27   :  { %452 = shalt.err (!%p449_p4)
}
  0x28   :  { %s453_s11 = scalar_lea.vmem %s43_s25, 1024  ;;  %p458_p6 = scmp.lt.s32.totalorder %s43_s25, %s43_s25 }
  0x29   :  { %p454_p5 = scmp.ne.s32.totalorder %s43_s25, %s453_s11  ;;  %p459_p7 = scmp.lt.s32.totalorder %s453_s11, %s453_s11 }
  0x2b   :  { %p460_p8 = por %p459_p7, %p458_p6 }
  0x2d   :  { %p461_p9 = pnand %p460_p8, %p454_p5 }
  0x2f   :  { %464 = shalt.err (!%p461_p9)
}
  0x30   :  { %s472_s0 = smov 128   ;;  %s473_s27 = smov 8  }
  0x31   :  { %48 = dma.hbm_to_vmem [thread:$0]  %s582_s3, 1024, %s43_s25, [#allocation6], %s472_s0, %s472_s0, %s473_s27  }
  0x32   :  { %465 = dma.done.wait [#allocation4], 128  }
  0x33   :  { %466 = vsyncadd [#allocation4], 4294967168 }
  0x34   :  { %467 = dma.done.wait [#allocation6], 1152  }
  0x35   :  { %468 = vsyncadd [#allocation6], 4294966144  ;;  %v474_v0 = vmov 0   ;;  %v475_v1 = vmov 2   ;;  %v64_v2 = vld [vmem:[#allocation3] sm:$0xff]  ;;  %v476_v3 = vmov 1   ;;  %v314_v55 = vstv %s585_s6 }
  0x36   :  { %393 = vset.pattern.permute.xlu0 %v474_v0  ;;  %395 = vset.pattern.permute.xlu1 %v475_v1  ;;  %v477_v4 = vmov 3   ;;  %v129_v5 = vld [vmem:[#allocation7] sm:$0xff]  ;;  %v130_v6 = vld [vmem:[#allocation7 + $0x8] sm:$0xff]  ;;  %v478_v8 = vmov 4   ;;  %v479_v9 = vmov 0.0|0.0   ;;  %v131_v10 = vld [vmem:[#allocation7 + $0x10] sm:$0xff] }
  0x37   :  { %68 = vperm.xlu0 %393, %v64_v2   ;;  %97 = vperm.xlu1 %395, %v64_v2   ;;  %v369_v7 = vpack.c.bf16 %v130_v6, %v129_v5  ;;  %v132_v11 = vld [vmem:[#allocation7 + $0x18] sm:$0xff]  ;;  %vm480_vm0 = vmmov 0   ;;  %v481_v13 = vmov 0.0   ;;  %v216_v14 = vld [vmem:[#allocation7 + $0x20] sm:$0xff]  ;;  %v217_v15 = vld [vmem:[#allocation7 + $0x28] sm:$0xff]  ;;  %vm140_vm1 = vcmask 261120  }
  0x38   :  { %368 = vmatprep.subr.bf16.mxu0 %v479_v9  ;;  %374 = vmatprep.subr.bf16.mxu1 %v479_v9  ;;  %v372_v12 = vpack.c.bf16 %v132_v11, %v131_v10  ;;  %v375_v16 = vpack.c.bf16 %v217_v15, %v216_v14  ;;  %v324_v17 = vld [vmem:[#allocation5] ss:$0 sm:$0xff]  ;;  %v325_v21 = vld [vmem:[%s581_s2] ss:$0 sm:$0xff]  ;;  %v326_v22 = vld [vmem:[#allocation5 + $0x1] ss:$0 sm:$0xff] }
  0x39   :  { %370 = vmatpush3.bf16.msra.mxu0 %v369_v7  ;;  %354 = vmatprep.mubr.msk.f32.mxu0 %vm480_vm0, %v481_v13  ;;  %v327_v23 = vld [vmem:[#allocation5 + $0x2] ss:$0 sm:$0xff]  ;;  %v328_v28 = vld [vmem:[#allocation5 + $0x3] ss:$0 sm:$0xff]  ;;  %v329_v31 = vld [vmem:[#allocation5 + $0x4] ss:$0 sm:$0xff] }
  0x3a   :  { %371 = vmatprep.subr.bf16.mxu0 %v479_v9  ;;  %365 = vmatprep.mubr.msk.f32.mxu1 %vm480_vm0, %v481_v13  ;;  %v218_v39 = vld [vmem:[#allocation7 + $0x30] sm:$0xff]  ;;  %v219_v40 = vld [vmem:[#allocation7 + $0x38] sm:$0xff]  ;;  %vm316_vm2 = vcmask 7168  }
  0x3b   :  { %394 = vset.pattern.permute.xlu0 %v476_v3  ;;  %396 = vset.pattern.permute.xlu1 %v477_v4  ;;  %v378_v41 = vpack.c.bf16 %v219_v40, %v218_v39  ;;  %v330_v42 = vld [vmem:[%s583_s4] ss:$0 sm:$0xff]  ;;  %v333_v47 = vld [vmem:[%s583_s4 + $0x1] ss:$0 sm:$0xff] }
  0x3c   :  { %86 = vperm.xlu0 %394, %v64_v2   ;;  %108 = vperm.xlu1 %396, %v64_v2   ;;  %v335_v51 = vld [vmem:[%s584_s5] ss:$0 sm:$0xff] }
  0x3d   :  { %373 = vmatpush3.bf16.msra.mxu0 %v372_v12  ;;  %376 = vmatpush3.bf16.msra.mxu1 %v375_v16 }
  0x3e   :  { %377 = vmatprep.subr.bf16.mxu1 %v479_v9 }
  0x40   :  { %397 = vset.pattern.permute.xlu1 %v478_v8  ;;  %398 = vset.pattern.permute.xlu0 %v478_v8 }
  0x41   :  { %119 = vperm.xlu1 %397, %v64_v2   ;;  %379 = vmatpush3.bf16.msra.mxu1 %v378_v41 }
  0xb6   :  { %v69_v18 = vpop.permute.xlu0 %68  ;;  %v98_v19 = vpop.permute.xlu1 %97 }
  0xb7   :  { %v75_v20 = vmul.f32 %v324_v17, %v69_v18  ;;  %v104_v29 = vmul.f32 %v327_v23, %v98_v19 }
  0xb9   :  { %v83_v26 = vadd.f32 %v325_v21, %v75_v20 }
  0xbb   :  { %v87_v24 = vpop.permute.xlu0 %86  ;;  %v109_v25 = vpop.permute.xlu1 %108 }
  0xbc   :  { %v93_v27 = vmul.f32 %v326_v22, %v87_v24  ;;  %v115_v33 = vmul.f32 %v328_v28, %v109_v25 }
  0xbe   :  { %v94_v30 = vadd.f32 %v93_v27, %v83_v26 }
  0xc0   :  { %v105_v32 = vadd.f32 %v104_v29, %v94_v30  ;;  %v120_v34 = vpop.permute.xlu1 %119 }
  0xc1   :  { %v126_v35 = vmul.f32 %v329_v31, %v120_v34 }
  0xc2   :  { %v116_v36 = vadd.f32 %v115_v33, %v105_v32 }
  0xc4   :  { %v127_v37 = vadd.f32 %v126_v35, %v116_v36 }
  0xc6   :  { %v128_v38 = vmax.f32 %v127_v37, 0.0 }
  0xc8   :  { %355 = vmatmul.mubr.msk.f32.vlgmr.msra.gmra.mrb[0].mxu0 %vm140_vm1, %v128_v38 }
 0x19b   :  { %v210_v43 = vpop.f32.mrb[0].mxu0 }
 0x19c   :  { %v211_v44 = vadd.f32 %v330_v42, %v210_v43  ;;  %v356_v45 = vpop.f32.mrb[1].mxu0 }
 0x19e   :  { %v214_v46 = vmax.f32 %v211_v44, 0.0 }
 0x1a0   :  { %366 = vmatmul.mubr.msk.f32.vlgmr.msra.gmra.mrb[0].mxu1 %vm140_vm1, %v214_v46 }
 0x273   :  { %v297_v48 = vpop.f32.mrb[0].mxu1 }
 0x274   :  { %v298_v49 = vadd.f32 %v333_v47, %v297_v48  ;;  %v367_v50 = vpop.f32.mrb[1].mxu1 }
 0x276   :  { %v301_v52 = vmax.f32 %v298_v49, 0.0 }
 0x278   :  { %v309_v53 = vmul.f32 %v335_v51, %v301_v52 }
 0x27a   :  { %v310_v54 = vsel %vm140_vm1, %v309_v53, 0.0 }
 0x27b   :  { %311 = vadd.xlane.f32.xlu0 %v310_v54 }
 0x308   :  { %v312_v56 = vpop.xlane.xlu0 %311 }
 0x309   :  { %v315_v57 = vadd.f32 %v314_v55, %v312_v56 }
 0x30b   :  { %317 = vst.msk [vmem:[%s586_s7] sm:$0xff] %vm316_vm2, %v315_v57 }
 0x30c   :  { %322 = vsyncpa [#allocation4], 1 }
 0x30d   :  { %323 = vsyncpa [#allocation6], 1 }

</bundles_post_ra>
